<compile_context>
chip_gen: v7x
topology: tpu7x:2x2x1
jax: 0.10.0
libtpu: 0.0.40
codegen_flags: <defaults>
</compile_context>

<pallas_src>
import functools

import jax
import jax.numpy as jnp
from jax.experimental import pallas as pl
from jax.experimental.pallas import tpu as pltpu

# NOTE: for very large hidden dims on v6e/v7x, aligning feature dims to 256
# would fill the 2x256x256 MXU better; 128 is optimal for v5e (4x128x128 MXU)
# and fine for this model's sizes.
LANE = 128


def _round_up(x, m):
    return ((x + m - 1) // m) * m


def _choose_batch_tiling(batch):
    """Pick (tile_rows, padded_batch, num_tiles).

    Goals: >= 2 grid steps when practical (so the "parallel" batch axis shards
    across v7x's two TensorCores), row tiles of roughly <= 512, 16-row
    (sublane, bf16-safe) alignment, and bounded batch-padding waste.
    """
    b16 = _round_up(batch, 16)
    cand_tiles = {pl.cdiv(b16, 512), pl.cdiv(b16, 256)}
    if b16 >= 32:
        cand_tiles.add(2)  # v7x megacore: split even mid-size batches

    options = []
    for nt in cand_tiles:
        nt = max(1, nt)
        tb = _round_up(pl.cdiv(b16, nt), 16)
        nt = pl.cdiv(b16, tb)
        options.append((tb * nt, nt, tb))  # (padded_batch, num_tiles, tile)

    min_bp = min(o[0] for o in options)
    allowed = min_bp + max(16, min_bp // 8)  # <= ~12.5% extra padding allowed
    viable = [o for o in options if o[0] <= allowed]
    bp, nt, tb = min(viable, key=lambda o: (-o[1], o[0]))  # prefer more tiles
    return tb, bp, nt


def _make_classifier_kernel(num_hidden_layers):
    """Fused kernel: L x (Linear + ReLU) then one fused-head Linear.

    Ref order: x, (w_i, b_i) * L, w_head, b_head, out
      x        : [TB, d_in_p]        (original input dtype; cast in-kernel)
      w_i      : [d_in_p, d_out_p]   (compute dtype, zero padded)
      b_i      : [1, d_out_p]        (f32, zero padded)
      w_head   : [d_last_p, head_p]  col 0 = disc, cols 1..C = classifier
      out      : [TB, head_p]        lane-dense slab, compute dtype
    """

    def kernel(*refs):
        x_ref = refs[0]
        hid_refs = refs[1 : 1 + 2 * num_hidden_layers]
        wh_ref = refs[1 + 2 * num_hidden_layers]
        bh_ref = refs[2 + 2 * num_hidden_layers]
        out_ref = refs[3 + 2 * num_hidden_layers]

        compute_dtype = wh_ref.dtype  # weights carry the MXU operand dtype
        h = x_ref[...].astype(compute_dtype)

        for i in range(num_hidden_layers):
            w = hid_refs[2 * i][...]
            b = hid_refs[2 * i + 1][...]  # f32 [1, d_out_p]
            acc = jnp.dot(h, w, preferred_element_type=jnp.float32) + b
            h = jnp.maximum(acc, 0.0).astype(compute_dtype)  # nn.ReLU()

        # Fused heads: one lane-dense matmul.  Sigmoid (EUP) + select only on
        # the first 128-lane slab (column 0 is the discriminator).
        y = jnp.dot(h, wh_ref[...], preferred_element_type=jnp.float32) + bh_ref[...]
        y0 = y[:, :LANE]
        col = jax.lax.broadcasted_iota(jnp.int32, y0.shape, dimension=1)
        y0 = jnp.where(col == 0, jax.nn.sigmoid(y0), y0)
        out_ref[:, :LANE] = y0.astype(out_ref.dtype)
        if y.shape[1] > LANE:
            out_ref[:, LANE:] = y[:, LANE:].astype(out_ref.dtype)

    return kernel


@functools.partial(
    jax.jit, static_argnames=("compute_dtype", "single_buffer_weights")
)
def _forward_impl(x, flat_params, *, compute_dtype, single_buffer_weights):
    """flat_params = (w1, b1, ..., wL, bL, w_disc, b_disc, w_cls, b_cls).

    Weights are pre-transposed [in, out]; biases are [1, out].
    compute_dtype: "float32" (exact) or "bfloat16" (bf16 MXU operands, f32 acc;
    valid on v5e / v6e / v7x — bias/ReLU/sigmoid stay in f32).
    """
    cd = jnp.dtype(compute_dtype)
    num_hidden_layers = (len(flat_params) - 4) // 2
    batch, data_dim = x.shape
    num_classes = flat_params[-2].shape[-1]

    tb, bp, num_tiles = _choose_batch_tiling(batch)
    dp = _round_up(data_dim, LANE)

    def pad2(a, rows, cols):
        if a.shape == (rows, cols):
            return a
        return jnp.pad(a, ((0, rows - a.shape[0]), (0, cols - a.shape[1])))

    # --- pad & pack parameters (zero padding keeps the math identical) -----
    packed = []
    layer_dims = []
    in_dim_p = dp
    for i in range(num_hidden_layers):
        w = flat_params[2 * i]
        b = flat_params[2 * i + 1].reshape(1, -1)
        out_dim_p = _round_up(w.shape[1], LANE)
        packed.append(pad2(w, in_dim_p, out_dim_p).astype(cd))
        packed.append(pad2(b, 1, out_dim_p).astype(jnp.float32))
        layer_dims.append((in_dim_p, out_dim_p))
        in_dim_p = out_dim_p

    wd, bd, wc, bc = flat_params[-4:]
    head_w = jnp.concatenate([wd, wc], axis=1)  # [h_last, 1 + C]
    head_b = jnp.concatenate([bd.reshape(1, -1), bc.reshape(1, -1)], axis=1)
    head_out_p = _round_up(1 + num_classes, LANE)
    packed.append(pad2(head_w, in_dim_p, head_out_p).astype(cd))
    packed.append(pad2(head_b, 1, head_out_p).astype(jnp.float32))
    layer_dims.append((in_dim_p, head_out_p))

    # --- x: no extra HBM pass unless padding is actually required ----------
    if (bp, dp) == (batch, data_dim):
        xp = x
    else:
        xp = jnp.pad(x, ((0, bp - batch), (0, dp - data_dim)))

    # --- BlockSpecs ---------------------------------------------------------
    # Weights/biases are grid-invariant -> single-buffer them when supported.
    use_single = single_buffer_weights and hasattr(pl, "Buffered")
    if use_single:
        def const_spec(shape):
            return pl.BlockSpec(shape, lambda i: (0, 0),
                                pipeline_mode=pl.Buffered(1))
    else:
        def const_spec(shape):
            return pl.BlockSpec(shape, lambda i: (0, 0))

    in_specs = [pl.BlockSpec((tb, dp), lambda i: (i, 0))]
    for p in packed:
        in_specs.append(const_spec(p.shape))
    out_spec = pl.BlockSpec((tb, head_out_p), lambda i: (i, 0))

    # --- cost / VMEM hints ---------------------------------------------------
    flops = 2 * bp * sum(din * dout for din, dout in layer_dims)
    param_bytes = sum(int(p.size) * p.dtype.itemsize for p in packed)
    out_itemsize = cd.itemsize
    bytes_accessed = (int(xp.size) * xp.dtype.itemsize + param_bytes
                      + bp * head_out_p * out_itemsize)
    weight_bufs = 1 if use_single else 2
    tile_bytes = (2 * tb * dp * xp.dtype.itemsize
                  + 2 * tb * head_out_p * out_itemsize)
    vmem_bytes = int(1.25 * (weight_bufs * param_bytes + tile_bytes)) + (2 << 20)
    vmem_bytes = min(max(vmem_bytes, 16 * 1024 * 1024), 40 * 1024 * 1024)

    out = pl.pallas_call(
        _make_classifier_kernel(num_hidden_layers),
        out_shape=jax.ShapeDtypeStruct((bp, head_out_p), cd),
        grid_spec=pltpu.PrefetchScalarGridSpec(
            num_scalar_prefetch=0,
            grid=(num_tiles,),
            in_specs=in_specs,
            out_specs=out_spec,
        ),
        compiler_params=pltpu.CompilerParams(
            dimension_semantics=("parallel",),
            vmem_limit_bytes=vmem_bytes,
        ),
        cost_estimate=pl.CostEstimate(
            flops=flops,
            transcendentals=bp * LANE,
            bytes_accessed=bytes_accessed,
        ),
    )(xp, *packed)

    disc_out = out[:batch, 0:1].astype(x.dtype)
    cls_out = out[:batch, 1 : 1 + num_classes].astype(x.dtype)
    return disc_out, cls_out


# Cached decision for whether this JAX build accepts Buffered(1) on the
# grid-invariant weight BlockSpecs; falls back to default double-buffering.
_SINGLE_BUFFER_OK = None


def classifier_forward(x, flat_params, *, compute_dtype="float32"):
    global _SINGLE_BUFFER_OK
    flat_params = tuple(flat_params)
    if _SINGLE_BUFFER_OK is None:
        try:
            out = _forward_impl(x, flat_params, compute_dtype=compute_dtype,
                                single_buffer_weights=True)
            jax.block_until_ready(out)
            _SINGLE_BUFFER_OK = True
            return out
        except Exception:
            _SINGLE_BUFFER_OK = False
    return _forward_impl(x, flat_params, compute_dtype=compute_dtype,
                         single_buffer_weights=_SINGLE_BUFFER_OK)


def _linear_init(key, fan_in, fan_out):
    """PyTorch-style nn.Linear init: U(-1/sqrt(fan_in), 1/sqrt(fan_in)).

    Weight returned pre-transposed as [in, out]; bias as [1, out]."""
    kw, kb = jax.random.split(key)
    bound = 1.0 / jnp.sqrt(jnp.float32(fan_in))
    w = jax.random.uniform(kw, (fan_in, fan_out), jnp.float32, -bound, bound)
    b = jax.random.uniform(kb, (1, fan_out), jnp.float32, -bound, bound)
    return w, b


def _reference_forward(x, flat_params, num_hidden_layers):
    """Pure-JAX reference mirroring the PyTorch module."""
    h = x
    for i in range(num_hidden_layers):
        w, b = flat_params[2 * i], flat_params[2 * i + 1]
        h = jnp.maximum(h @ w + b, 0.0)
    wd, bd, wc, bc = flat_params[-4:]
    return jax.nn.sigmoid(h @ wd + bd), h @ wc + bc


if __name__ == "__main__":
    key = jax.random.PRNGKey(0)

    # Small, module-consistent shapes.
    batch = 8
    data_dim = 32
    hidden_dimensions = [64, 32]
    num_classes = 4
    num_hidden_layers = len(hidden_dimensions)

    keys = jax.random.split(key, num_hidden_layers + 3)

    dims = [data_dim] + hidden_dimensions
    flat_params = []
    for i in range(1, len(dims)):
        w, b = _linear_init(keys[i - 1], dims[i - 1], dims[i])
        flat_params += [w, b]
    wd, bd = _linear_init(keys[num_hidden_layers], hidden_dimensions[-1], 1)
    wc, bc = _linear_init(keys[num_hidden_layers + 1], hidden_dimensions[-1],
                          num_classes)
    flat_params += [wd, bd, wc, bc]

    x = jax.random.normal(keys[-1], (batch, data_dim), jnp.float32)

    ref_disc, ref_cls = _reference_forward(x, flat_params, num_hidden_layers)

    # --- f32 path: exact check ------------------------------------------------
    disc_out, cls_out = classifier_forward(x, flat_params, compute_dtype="float32")
    jax.block_until_ready((disc_out, cls_out))
    assert disc_out.shape == (batch, 1) and cls_out.shape == (batch, num_classes)
    assert jnp.allclose(disc_out, ref_disc, atol=1e-5, rtol=1e-5)
    assert jnp.allclose(cls_out, ref_cls, atol=1e-5, rtol=1e-5)

    # --- bf16-at-the-MXU path (f32 accumulation): loose check -----------------
    disc_bf, cls_bf = classifier_forward(x, flat_params, compute_dtype="bfloat16")
    jax.block_until_ready((disc_bf, cls_bf))
    assert jnp.allclose(disc_bf, ref_disc, atol=1e-1, rtol=1e-1)
    assert jnp.allclose(cls_bf, ref_cls, atol=1e-1, rtol=1e-1)

    print("KERNEL_OK")
</pallas_src>

<mosaic_0001>
module attributes {stable_mosaic.version = 11 : i64} {
  func.func @kernel(%arg0: i32, %arg1: memref<16x128xf32, #tpu.memory_space<vmem>>, %arg2: memref<128x128xf32, #tpu.memory_space<vmem>>, %arg3: memref<1x128xf32, #tpu.memory_space<vmem>>, %arg4: memref<128x128xf32, #tpu.memory_space<vmem>>, %arg5: memref<1x128xf32, #tpu.memory_space<vmem>>, %arg6: memref<128x128xf32, #tpu.memory_space<vmem>>, %arg7: memref<1x128xf32, #tpu.memory_space<vmem>>, %arg8: memref<16x128xf32, #tpu.memory_space<vmem>>) attributes {dimension_semantics = [#tpu.dimension_semantics<parallel>], iteration_bounds = array<i64: 1>, scalar_prefetch = 0 : i64, scratch_operands = 0 : i64, tpu.core_type = #tpu.core_type<tc>, window_params = [{transform_indices = @transform_0, window_bounds = array<i64: 16, 128>}, {pipeline_mode = #tpu.pipeline_mode<synchronous>, transform_indices = @transform_1, window_bounds = array<i64: 128, 128>}, {pipeline_mode = #tpu.pipeline_mode<synchronous>, transform_indices = @transform_2, window_bounds = array<i64: 1, 128>}, {pipeline_mode = #tpu.pipeline_mode<synchronous>, transform_indices = @transform_3, window_bounds = array<i64: 128, 128>}, {pipeline_mode = #tpu.pipeline_mode<synchronous>, transform_indices = @transform_4, window_bounds = array<i64: 1, 128>}, {pipeline_mode = #tpu.pipeline_mode<synchronous>, transform_indices = @transform_5, window_bounds = array<i64: 128, 128>}, {pipeline_mode = #tpu.pipeline_mode<synchronous>, transform_indices = @transform_6, window_bounds = array<i64: 1, 128>}, {transform_indices = @transform_7, window_bounds = array<i64: 16, 128>}]} {
    %c0 = arith.constant 0 : index
    %c0_0 = arith.constant 0 : index
    %0 = vector.load %arg1[%c0, %c0_0] : memref<16x128xf32, #tpu.memory_space<vmem>>, vector<16x128xf32>
    %c0_1 = arith.constant 0 : index
    %c0_2 = arith.constant 0 : index
    %1 = vector.load %arg2[%c0_1, %c0_2] : memref<128x128xf32, #tpu.memory_space<vmem>>, vector<128x128xf32>
    %c0_3 = arith.constant 0 : index
    %c0_4 = arith.constant 0 : index
    %2 = vector.load %arg3[%c0_3, %c0_4] : memref<1x128xf32, #tpu.memory_space<vmem>>, vector<1x128xf32>
    %cst = arith.constant dense<0.000000e+00> : vector<16x128xf32>
    %3 = tpu.matmul %0, %1, %cst {dimension_numbers = #tpu.dot_dimension_numbers<[1], [0], [0], [1], [0, 0, 1, 1], [], []>} : vector<16x128xf32>, vector<128x128xf32>, vector<16x128xf32> -> vector<16x128xf32>
    %4 = vector.broadcast %2 : vector<1x128xf32> to vector<16x128xf32>
    %5 = arith.addf %3, %4 : vector<16x128xf32>
    %cst_5 = arith.constant 0.000000e+00 : f32
    %6 = vector.broadcast %cst_5 : f32 to vector<16x128xf32>
    %7 = arith.maximumf %5, %6 : vector<16x128xf32>
    %c0_6 = arith.constant 0 : index
    %c0_7 = arith.constant 0 : index
    %8 = vector.load %arg4[%c0_6, %c0_7] : memref<128x128xf32, #tpu.memory_space<vmem>>, vector<128x128xf32>
    %c0_8 = arith.constant 0 : index
    %c0_9 = arith.constant 0 : index
    %9 = vector.load %arg5[%c0_8, %c0_9] : memref<1x128xf32, #tpu.memory_space<vmem>>, vector<1x128xf32>
    %cst_10 = arith.constant dense<0.000000e+00> : vector<16x128xf32>
    %10 = tpu.matmul %7, %8, %cst_10 {dimension_numbers = #tpu.dot_dimension_numbers<[1], [0], [0], [1], [0, 0, 1, 1], [], []>} : vector<16x128xf32>, vector<128x128xf32>, vector<16x128xf32> -> vector<16x128xf32>
    %11 = vector.broadcast %9 : vector<1x128xf32> to vector<16x128xf32>
    %12 = arith.addf %10, %11 : vector<16x128xf32>
    %cst_11 = arith.constant 0.000000e+00 : f32
    %13 = vector.broadcast %cst_11 : f32 to vector<16x128xf32>
    %14 = arith.maximumf %12, %13 : vector<16x128xf32>
    %c0_12 = arith.constant 0 : index
    %c0_13 = arith.constant 0 : index
    %15 = vector.load %arg6[%c0_12, %c0_13] : memref<128x128xf32, #tpu.memory_space<vmem>>, vector<128x128xf32>
    %cst_14 = arith.constant dense<0.000000e+00> : vector<16x128xf32>
    %16 = tpu.matmul %14, %15, %cst_14 {dimension_numbers = #tpu.dot_dimension_numbers<[1], [0], [0], [1], [0, 0, 1, 1], [], []>} : vector<16x128xf32>, vector<128x128xf32>, vector<16x128xf32> -> vector<16x128xf32>
    %c0_15 = arith.constant 0 : index
    %c0_16 = arith.constant 0 : index
    %17 = vector.load %arg7[%c0_15, %c0_16] : memref<1x128xf32, #tpu.memory_space<vmem>>, vector<1x128xf32>
    %18 = vector.broadcast %17 : vector<1x128xf32> to vector<16x128xf32>
    %19 = arith.addf %16, %18 : vector<16x128xf32>
    %20 = tpu.iota {dimensions = array<i32: 1>} : vector<16x128xi32>
    %c0_i32 = arith.constant 0 : i32
    %21 = vector.broadcast %c0_i32 : i32 to vector<16x128xi32>
    %22 = arith.cmpi eq, %20, %21 : vector<16x128xi32>
    %23 = arith.negf %19 : vector<16x128xf32>
    %24 = math.exp %23 : vector<16x128xf32>
    %cst_17 = arith.constant 1.000000e+00 : f32
    %25 = vector.broadcast %cst_17 : f32 to vector<16x128xf32>
    %26 = arith.addf %25, %24 : vector<16x128xf32>
    %27 = arith.divf %25, %26 : vector<16x128xf32>
    %28 = arith.select %22, %27, %19 : vector<16x128xi1>, vector<16x128xf32>
    %c0_18 = arith.constant 0 : index
    %c0_19 = arith.constant 0 : index
    %29 = vector.load %arg8[%c0_18, %c0_19] : memref<16x128xf32, #tpu.memory_space<vmem>>, vector<16x128xf32>
    tpu.vector_store %arg8[%c0_18, %c0_19], %28 {strides = array<i32>} : memref<16x128xf32, #tpu.memory_space<vmem>>, vector<16x128xf32>,
    return
  }
  func.func @transform_0(%arg0: i32) -> (i32, i32) {
    %c0_i32 = arith.constant 0 : i32
    %c0_i32_0 = arith.constant 0 : i32
    return %arg0, %c0_i32 : i32, i32
  }
  func.func @transform_1(%arg0: i32) -> (i32, i32) {
    %c0_i32 = arith.constant 0 : i32
    %c0_i32_0 = arith.constant 0 : i32
    %c0_i32_1 = arith.constant 0 : i32
    return %c0_i32, %c0_i32_0 : i32, i32
  }
  func.func @transform_2(%arg0: i32) -> (i32, i32) {
    %c0_i32 = arith.constant 0 : i32
    %c0_i32_0 = arith.constant 0 : i32
    %c0_i32_1 = arith.constant 0 : i32
    return %c0_i32, %c0_i32_0 : i32, i32
  }
  func.func @transform_3(%arg0: i32) -> (i32, i32) {
    %c0_i32 = arith.constant 0 : i32
    %c0_i32_0 = arith.constant 0 : i32
    %c0_i32_1 = arith.constant 0 : i32
    return %c0_i32, %c0_i32_0 : i32, i32
  }
  func.func @transform_4(%arg0: i32) -> (i32, i32) {
    %c0_i32 = arith.constant 0 : i32
    %c0_i32_0 = arith.constant 0 : i32
    %c0_i32_1 = arith.constant 0 : i32
    return %c0_i32, %c0_i32_0 : i32, i32
  }
  func.func @transform_5(%arg0: i32) -> (i32, i32) {
    %c0_i32 = arith.constant 0 : i32
    %c0_i32_0 = arith.constant 0 : i32
    %c0_i32_1 = arith.constant 0 : i32
    return %c0_i32, %c0_i32_0 : i32, i32
  }
  func.func @transform_6(%arg0: i32) -> (i32, i32) {
    %c0_i32 = arith.constant 0 : i32
    %c0_i32_0 = arith.constant 0 : i32
    %c0_i32_1 = arith.constant 0 : i32
    return %c0_i32, %c0_i32_0 : i32, i32
  }
  func.func @transform_7(%arg0: i32) -> (i32, i32) {
    %c0_i32 = arith.constant 0 : i32
    %c0_i32_0 = arith.constant 0 : i32
    return %arg0, %c0_i32 : i32, i32
  }
}

module attributes {stable_mosaic.version = 11 : i64} {
  func.func @kernel(%arg0: i32, %arg1: memref<16x128xf32, #tpu.memory_space<vmem>>, %arg2: memref<128x128xf32, #tpu.memory_space<vmem>>, %arg3: memref<1x128xf32, #tpu.memory_space<vmem>>, %arg4: memref<128x128xf32, #tpu.memory_space<vmem>>, %arg5: memref<1x128xf32, #tpu.memory_space<vmem>>, %arg6: memref<128x128xf32, #tpu.memory_space<vmem>>, %arg7: memref<1x128xf32, #tpu.memory_space<vmem>>, %arg8: memref<16x128xf32, #tpu.memory_space<vmem>>) attributes {dimension_semantics = [#tpu.dimension_semantics<parallel>], iteration_bounds = array<i64: 1>, scalar_prefetch = 0 : i64, scratch_operands = 0 : i64, tpu.core_type = #tpu.core_type<tc>, window_params = [{transform_indices = @transform_0, window_bounds = array<i64: 16, 128>}, {pipeline_mode = #tpu.pipeline_mode<synchronous>, transform_indices = @transform_1, window_bounds = array<i64: 128, 128>}, {pipeline_mode = #tpu.pipeline_mode<synchronous>, transform_indices = @transform_2, window_bounds = array<i64: 1, 128>}, {pipeline_mode = #tpu.pipeline_mode<synchronous>, transform_indices = @transform_3, window_bounds = array<i64: 128, 128>}, {pipeline_mode = #tpu.pipeline_mode<synchronous>, transform_indices = @transform_4, window_bounds = array<i64: 1, 128>}, {pipeline_mode = #tpu.pipeline_mode<synchronous>, transform_indices = @transform_5, window_bounds = array<i64: 128, 128>}, {pipeline_mode = #tpu.pipeline_mode<synchronous>, transform_indices = @transform_6, window_bounds = array<i64: 1, 128>}, {transform_indices = @transform_7, window_bounds = array<i64: 16, 128>}]} {
    %c0 = arith.constant 0 : index
    %c0_0 = arith.constant 0 : index
    %0 = vector.load %arg1[%c0, %c0_0] : memref<16x128xf32, #tpu.memory_space<vmem>>, vector<16x128xf32>
    %c0_1 = arith.constant 0 : index
    %c0_2 = arith.constant 0 : index
    %1 = vector.load %arg2[%c0_1, %c0_2] : memref<128x128xf32, #tpu.memory_space<vmem>>, vector<128x128xf32>
    %c0_3 = arith.constant 0 : index
    %c0_4 = arith.constant 0 : index
    %2 = vector.load %arg3[%c0_3, %c0_4] : memref<1x128xf32, #tpu.memory_space<vmem>>, vector<1x128xf32>
    %cst = arith.constant dense<0.000000e+00> : vector<16x128xf32>
    %3 = tpu.matmul %0, %1, %cst {dimension_numbers = #tpu.dot_dimension_numbers<[1], [0], [0], [1], [0, 0, 1, 1], [], []>} : vector<16x128xf32>, vector<128x128xf32>, vector<16x128xf32> -> vector<16x128xf32>
    %4 = vector.broadcast %2 : vector<1x128xf32> to vector<16x128xf32>
    %5 = arith.addf %3, %4 : vector<16x128xf32>
    %cst_5 = arith.constant 0.000000e+00 : f32
    %6 = vector.broadcast %cst_5 : f32 to vector<16x128xf32>
    %7 = arith.maximumf %5, %6 : vector<16x128xf32>
    %c0_6 = arith.constant 0 : index
    %c0_7 = arith.constant 0 : index
    %8 = vector.load %arg4[%c0_6, %c0_7] : memref<128x128xf32, #tpu.memory_space<vmem>>, vector<128x128xf32>
    %c0_8 = arith.constant 0 : index
    %c0_9 = arith.constant 0 : index
    %9 = vector.load %arg5[%c0_8, %c0_9] : memref<1x128xf32, #tpu.memory_space<vmem>>, vector<1x128xf32>
    %cst_10 = arith.constant dense<0.000000e+00> : vector<16x128xf32>
    %10 = tpu.matmul %7, %8, %cst_10 {dimension_numbers = #tpu.dot_dimension_numbers<[1], [0], [0], [1], [0, 0, 1, 1], [], []>} : vector<16x128xf32>, vector<128x128xf32>, vector<16x128xf32> -> vector<16x128xf32>
    %11 = vector.broadcast %9 : vector<1x128xf32> to vector<16x128xf32>
    %12 = arith.addf %10, %11 : vector<16x128xf32>
    %cst_11 = arith.constant 0.000000e+00 : f32
    %13 = vector.broadcast %cst_11 : f32 to vector<16x128xf32>
    %14 = arith.maximumf %12, %13 : vector<16x128xf32>
    %c0_12 = arith.constant 0 : index
    %c0_13 = arith.constant 0 : index
    %15 = vector.load %arg6[%c0_12, %c0_13] : memref<128x128xf32, #tpu.memory_space<vmem>>, vector<128x128xf32>
    %cst_14 = arith.constant dense<0.000000e+00> : vector<16x128xf32>
    %16 = tpu.matmul %14, %15, %cst_14 {dimension_numbers = #tpu.dot_dimension_numbers<[1], [0], [0], [1], [0, 0, 1, 1], [], []>} : vector<16x128xf32>, vector<128x128xf32>, vector<16x128xf32> -> vector<16x128xf32>
    %c0_15 = arith.constant 0 : index
    %c0_16 = arith.constant 0 : index
    %17 = vector.load %arg7[%c0_15, %c0_16] : memref<1x128xf32, #tpu.memory_space<vmem>>, vector<1x128xf32>
    %18 = vector.broadcast %17 : vector<1x128xf32> to vector<16x128xf32>
    %19 = arith.addf %16, %18 : vector<16x128xf32>
    %20 = tpu.iota {dimensions = array<i32: 1>} : vector<16x128xi32>
    %c0_i32 = arith.constant 0 : i32
    %21 = vector.broadcast %c0_i32 : i32 to vector<16x128xi32>
    %22 = arith.cmpi eq, %20, %21 : vector<16x128xi32>
    %23 = arith.negf %19 : vector<16x128xf32>
    %24 = math.exp %23 : vector<16x128xf32>
    %cst_17 = arith.constant 1.000000e+00 : f32
    %25 = vector.broadcast %cst_17 : f32 to vector<16x128xf32>
    %26 = arith.addf %25, %24 : vector<16x128xf32>
    %27 = arith.divf %25, %26 : vector<16x128xf32>
    %28 = arith.select %22, %27, %19 : vector<16x128xi1>, vector<16x128xf32>
    %c0_18 = arith.constant 0 : index
    %c0_19 = arith.constant 0 : index
    %29 = vector.load %arg8[%c0_18, %c0_19] : memref<16x128xf32, #tpu.memory_space<vmem>>, vector<16x128xf32>
    tpu.vector_store %arg8[%c0_18, %c0_19], %28 {strides = array<i32>} : memref<16x128xf32, #tpu.memory_space<vmem>>, vector<16x128xf32>,
    return
  }
  func.func @transform_0(%arg0: i32) -> (i32, i32) {
    %c0_i32 = arith.constant 0 : i32
    %c0_i32_0 = arith.constant 0 : i32
    return %arg0, %c0_i32 : i32, i32
  }
  func.func @transform_1(%arg0: i32) -> (i32, i32) {
    %c0_i32 = arith.constant 0 : i32
    %c0_i32_0 = arith.constant 0 : i32
    %c0_i32_1 = arith.constant 0 : i32
    return %c0_i32, %c0_i32_0 : i32, i32
  }
  func.func @transform_2(%arg0: i32) -> (i32, i32) {
    %c0_i32 = arith.constant 0 : i32
    %c0_i32_0 = arith.constant 0 : i32
    %c0_i32_1 = arith.constant 0 : i32
    return %c0_i32, %c0_i32_0 : i32, i32
  }
  func.func @transform_3(%arg0: i32) -> (i32, i32) {
    %c0_i32 = arith.constant 0 : i32
    %c0_i32_0 = arith.constant 0 : i32
    %c0_i32_1 = arith.constant 0 : i32
    return %c0_i32, %c0_i32_0 : i32, i32
  }
  func.func @transform_4(%arg0: i32) -> (i32, i32) {
    %c0_i32 = arith.constant 0 : i32
    %c0_i32_0 = arith.constant 0 : i32
    %c0_i32_1 = arith.constant 0 : i32
    return %c0_i32, %c0_i32_0 : i32, i32
  }
  func.func @transform_5(%arg0: i32) -> (i32, i32) {
    %c0_i32 = arith.constant 0 : i32
    %c0_i32_0 = arith.constant 0 : i32
    %c0_i32_1 = arith.constant 0 : i32
    return %c0_i32, %c0_i32_0 : i32, i32
  }
  func.func @transform_6(%arg0: i32) -> (i32, i32) {
    %c0_i32 = arith.constant 0 : i32
    %c0_i32_0 = arith.constant 0 : i32
    %c0_i32_1 = arith.constant 0 : i32
    return %c0_i32, %c0_i32_0 : i32, i32
  }
  func.func @transform_7(%arg0: i32) -> (i32, i32) {
    %c0_i32 = arith.constant 0 : i32
    %c0_i32_0 = arith.constant 0 : i32
    return %arg0, %c0_i32 : i32, i32
  }
}

</mosaic_0001>

<bundles_post_ra>
// kernel: _forward_impl.1
= control target key start
LH: loop header
LB: loop body
LE: loop exit
PB: predicated region body
PF: predicated region fallthrough
CT: control target
= control target key end

     0   :  { %s822_s1 = inlined_call_operand.vmem [shape: f32[128,128], index: 1, kind: input, shape index: {}]   ;;  %s823_s0 = inlined_call_operand.vmem [shape: f32[16,128], index: 0, kind: input, shape index: {}]   ;;  %s824_s3 = inlined_call_operand.vmem [shape: f32[128,128], index: 3, kind: input, shape index: {}]   ;;  %s825_s5 = inlined_call_operand.vmem [shape: f32[128,128], index: 5, kind: input, shape index: {}]   ;;  %s826_s2 = inlined_call_operand.vmem [shape: f32[1,128], index: 2, kind: input, shape index: {}]   ;;  %s827_s4 = inlined_call_operand.vmem [shape: f32[1,128], index: 4, kind: input, shape index: {}]   ;;  %s828_s6 = inlined_call_operand.vmem [shape: f32[1,128], index: 6, kind: input, shape index: {}]   ;;  %s829_s7 = inlined_call_operand.vmem [shape: f32[16,128], index: 7, kind: output, shape index: {}]  }
   0x1   :  { %v28_v0 = vld [vmem:[%s822_s1] sm:$0xff]  ;;  %v29_v1 = vld [vmem:[%s822_s1 + $0x8] sm:$0xff]  ;;  %v30_v2 = vld [vmem:[%s822_s1 + $0x10] sm:$0xff] }
   0x2   :  { %v513_v3 = vpack.c.bf16 %v29_v1, %v28_v0  ;;  %v31_v4 = vld [vmem:[%s822_s1 + $0x18] sm:$0xff]  ;;  %v32_v6 = vld [vmem:[%s822_s1 + $0x20] sm:$0xff]  ;;  %v33_v7 = vld [vmem:[%s822_s1 + $0x28] sm:$0xff] }
   0x3   :  { %v517_v5 = vpack.c.bf16 %v31_v4, %v30_v2  ;;  %v521_v8 = vpack.c.bf16 %v33_v7, %v32_v6  ;;  %v34_v9 = vld [vmem:[%s822_s1 + $0x30] sm:$0xff]  ;;  %v35_v10 = vld [vmem:[%s822_s1 + $0x38] sm:$0xff]  ;;  %v26_v11 = vld [vmem:[%s823_s0] sm:$0xff] }
   0x4   :  { %514 = vmatprep.subr.bf16.mxu0 %v513_v3  ;;  %440 = vmatprep.mubr.f32.mxu0 %v26_v11  ;;  %v128_v12 = vld [vmem:[%s824_s3] sm:$0xff]  ;;  %v129_v13 = vld [vmem:[%s824_s3 + $0x8] sm:$0xff]  ;;  %v130_v14 = vld [vmem:[%s824_s3 + $0x10] sm:$0xff]  ;;  %v525_v20 = vpack.c.bf16 %v35_v10, %v34_v9 }
   0x5   :  { %516 = vmatpush3.bf16.msra.mxu0 %v513_v3  ;;  %v545_v15 = vpack.c.bf16 %v129_v13, %v128_v12  ;;  %v131_v16 = vld [vmem:[%s824_s3 + $0x18] sm:$0xff]  ;;  %v132_v18 = vld [vmem:[%s824_s3 + $0x20] sm:$0xff]  ;;  %v133_v19 = vld [vmem:[%s824_s3 + $0x28] sm:$0xff] }
   0x6   :  { %518 = vmatprep.subr.bf16.mxu0 %v517_v5  ;;  %v549_v17 = vpack.c.bf16 %v131_v16, %v130_v14  ;;  %v36_v21 = vld [vmem:[%s822_s1 + $0x40] sm:$0xff]  ;;  %v37_v22 = vld [vmem:[%s822_s1 + $0x48] sm:$0xff]  ;;  %v553_v23 = vpack.c.bf16 %v133_v19, %v132_v18  ;;  %v134_v24 = vld [vmem:[%s824_s3 + $0x30] sm:$0xff] }
   0x7   :  { %546 = vmatprep.subr.bf16.mxu1 %v545_v15  ;;  %v135_v25 = vld [vmem:[%s824_s3 + $0x38] sm:$0xff]  ;;  %v529_v26 = vpack.c.bf16 %v37_v22, %v36_v21  ;;  %v38_v27 = vld [vmem:[%s822_s1 + $0x50] sm:$0xff]  ;;  %v136_v30 = vld [vmem:[%s824_s3 + $0x40] sm:$0xff] }
   0x8   :  { %548 = vmatpush3.bf16.msra.mxu1 %v545_v15  ;;  %v39_v28 = vld [vmem:[%s822_s1 + $0x58] sm:$0xff]  ;;  %v557_v29 = vpack.c.bf16 %v135_v25, %v134_v24  ;;  %v137_v31 = vld [vmem:[%s824_s3 + $0x48] sm:$0xff]  ;;  %v40_v33 = vld [vmem:[%s822_s1 + $0x60] sm:$0xff] }
   0x9   :  { %520 = vmatpush3.bf16.msra.mxu0 %v517_v5  ;;  %550 = vmatprep.subr.bf16.mxu1 %v549_v17  ;;  %v533_v32 = vpack.c.bf16 %v39_v28, %v38_v27  ;;  %v41_v34 = vld [vmem:[%s822_s1 + $0x68] sm:$0xff]  ;;  %v561_v35 = vpack.c.bf16 %v137_v31, %v136_v30  ;;  %v138_v36 = vld [vmem:[%s824_s3 + $0x50] sm:$0xff]  ;;  %v139_v37 = vld [vmem:[%s824_s3 + $0x58] sm:$0xff] }
   0xa   :  { %522 = vmatprep.subr.bf16.mxu0 %v521_v8  ;;  %v537_v38 = vpack.c.bf16 %v41_v34, %v40_v33  ;;  %v42_v39 = vld [vmem:[%s822_s1 + $0x70] sm:$0xff]  ;;  %v43_v40 = vld [vmem:[%s822_s1 + $0x78] sm:$0xff]  ;;  %v565_v41 = vpack.c.bf16 %v139_v37, %v138_v36  ;;  %v140_v42 = vld [vmem:[%s824_s3 + $0x60] sm:$0xff] }
   0xb   :  { %v141_v43 = vld [vmem:[%s824_s3 + $0x68] sm:$0xff]  ;;  %v541_v44 = vpack.c.bf16 %v43_v40, %v42_v39  ;;  %v142_v47 = vld [vmem:[%s824_s3 + $0x70] sm:$0xff]  ;;  %v143_v48 = vld [vmem:[%s824_s3 + $0x78] sm:$0xff] }
   0xc   :  { %552 = vmatpush3.bf16.msra.mxu1 %v549_v17  ;;  %v569_v45 = vpack.c.bf16 %v141_v43, %v140_v42  ;;  %v27_v46 = vld [vmem:[%s823_s0 + $0x8] sm:$0xff]  ;;  %v573_v49 = vpack.c.bf16 %v143_v48, %v142_v47  ;;  %v228_v50 = vld [vmem:[%s825_s5] sm:$0xff]  ;;  %v230_v52 = vld [vmem:[%s825_s5 + $0x10] sm:$0xff] }
   0xd   :  { %524 = vmatpush3.bf16.msra.mxu0 %v521_v8  ;;  %554 = vmatprep.subr.bf16.mxu1 %v553_v23  ;;  %v229_v51 = vld [vmem:[%s825_s5 + $0x8] sm:$0xff]  ;;  %v231_v54 = vld [vmem:[%s825_s5 + $0x18] sm:$0xff]  ;;  %v232_v56 = vld [vmem:[%s825_s5 + $0x20] sm:$0xff] }
   0xe   :  { %526 = vmatprep.subr.bf16.mxu0 %v525_v20  ;;  %v577_v53 = vpack.c.bf16 %v229_v51, %v228_v50  ;;  %v581_v55 = vpack.c.bf16 %v231_v54, %v230_v52  ;;  %v233_v57 = vld [vmem:[%s825_s5 + $0x28] sm:$0xff]  ;;  %v234_v59 = vld [vmem:[%s825_s5 + $0x30] sm:$0xff]  ;;  %v235_v60 = vld [vmem:[%s825_s5 + $0x38] sm:$0xff] }
   0xf   :  { %v585_v58 = vpack.c.bf16 %v233_v57, %v232_v56  ;;  %v589_v61 = vpack.c.bf16 %v235_v60, %v234_v59  ;;  %v236_v62 = vld [vmem:[%s825_s5 + $0x40] sm:$0xff]  ;;  %v237_v63 = vld [vmem:[%s825_s5 + $0x48] sm:$0xff]  ;;  %v238_v1 = vld [vmem:[%s825_s5 + $0x50] sm:$0xff] }
  0x10   :  { %556 = vmatpush3.bf16.msra.mxu1 %v553_v23  ;;  %v593_v0 = vpack.c.bf16 %v237_v63, %v236_v62  ;;  %v239_v2 = vld [vmem:[%s825_s5 + $0x58] sm:$0xff]  ;;  %v240_v4 = vld [vmem:[%s825_s5 + $0x60] sm:$0xff]  ;;  %v241_v5 = vld [vmem:[%s825_s5 + $0x68] sm:$0xff] }
  0x11   :  { %528 = vmatpush3.bf16.msra.mxu0 %v525_v20  ;;  %558 = vmatprep.subr.bf16.mxu1 %v557_v29  ;;  %v597_v3 = vpack.c.bf16 %v239_v2, %v238_v1  ;;  %v601_v6 = vpack.c.bf16 %v241_v5, %v240_v4  ;;  %v349_v7 = vld [vmem:[%s826_s2] ss:$0 sm:$0xff]  ;;  %v242_v14 = vld [vmem:[%s825_s5 + $0x70] sm:$0xff]  ;;  %v243_v15 = vld [vmem:[%s825_s5 + $0x78] sm:$0xff] }
  0x12   :  { %530 = vmatprep.subr.bf16.mxu0 %v529_v26  ;;  %v605_v16 = vpack.c.bf16 %v243_v15, %v242_v14  ;;  %v350_v17 = vld [vmem:[%s827_s4] ss:$0 sm:$0xff] }
  0x13   :  { %v351_v24 = vld [vmem:[%s828_s6] ss:$0 sm:$0xff] }
  0x14   :  { %560 = vmatpush3.bf16.msra.mxu1 %v557_v29 }
  0x15   :  { %532 = vmatpush3.bf16.msra.mxu0 %v529_v26  ;;  %562 = vmatprep.subr.bf16.mxu1 %v561_v35 }
  0x16   :  { %534 = vmatprep.subr.bf16.mxu0 %v533_v32 }
  0x18   :  { %564 = vmatpush3.bf16.msra.mxu1 %v561_v35  ;;  %v326_v35 = vlaneseq }
  0x19   :  { %536 = vmatpush3.bf16.msra.mxu0 %v533_v32  ;;  %566 = vmatprep.subr.bf16.mxu1 %v565_v41 }
  0x1a   :  { %538 = vmatprep.subr.bf16.mxu0 %v537_v38  ;;  %v327_v36 = vand.u32 127, %v326_v35 }
  0x1c   :  { %568 = vmatpush3.bf16.msra.mxu1 %v565_v41  ;;  %vm328_vm0 = vcmp.eq.s32.totalorder %v327_v36, 0 }
  0x1d   :  { %540 = vmatpush3.bf16.msra.mxu0 %v537_v38  ;;  %570 = vmatprep.subr.bf16.mxu1 %v569_v45 }
  0x1e   :  { %542 = vmatprep.subr.bf16.mxu0 %v541_v44 }
  0x20   :  { %572 = vmatpush3.bf16.msra.mxu1 %v569_v45 }
  0x21   :  { %544 = vmatpush3.bf16.msra.mxu0 %v541_v44  ;;  %574 = vmatprep.subr.bf16.mxu1 %v573_v49 }
  0x22   :  { %578 = vmatprep.subr.bf16.mxu0 %v577_v53 }
  0x24   :  { %441 = vmatmul.mubr.f32.vlgmr.msra.gmra.mrb[0].mxu0 %v27_v46  ;;  %576 = vmatpush3.bf16.msra.mxu1 %v573_v49 }
  0x25   :  { %580 = vmatpush3.bf16.msra.mxu0 %v577_v53 }
  0x26   :  { %582 = vmatprep.subr.bf16.mxu0 %v581_v55 }
  0x29   :  { %584 = vmatpush3.bf16.msra.mxu0 %v581_v55 }
  0x2a   :  { %586 = vmatprep.subr.bf16.mxu0 %v585_v58 }
  0x2d   :  { %588 = vmatpush3.bf16.msra.mxu0 %v585_v58 }
  0x2e   :  { %590 = vmatprep.subr.bf16.mxu0 %v589_v61 }
  0x31   :  { %592 = vmatpush3.bf16.msra.mxu0 %v589_v61 }
  0x32   :  { %594 = vmatprep.subr.bf16.mxu0 %v593_v0 }
  0x35   :  { %596 = vmatpush3.bf16.msra.mxu0 %v593_v0 }
  0x36   :  { %598 = vmatprep.subr.bf16.mxu0 %v597_v3 }
  0x39   :  { %600 = vmatpush3.bf16.msra.mxu0 %v597_v3 }
  0x3a   :  { %602 = vmatprep.subr.bf16.mxu0 %v601_v6 }
  0x3d   :  { %604 = vmatpush3.bf16.msra.mxu0 %v601_v6 }
  0x3e   :  { %606 = vmatprep.subr.bf16.mxu0 %v605_v16 }
  0x41   :  { %608 = vmatpush3.bf16.msra.mxu0 %v605_v16 }
  0xf7   :  { %v442_v8 = vpop.f32.mrb[0].mxu0 }
  0xf8   :  { %v123_v9 = vadd.f32 %v442_v8, %v349_v7  ;;  %v117_v10 = vpop.f32.mrb[1].mxu0 }
  0xf9   :  { %v118_v11 = vadd.f32 %v349_v7, %v117_v10 }
  0xfa   :  { %v127_v13 = vmax.f32 %v123_v9, 0.0 }
  0xfb   :  { %v126_v12 = vmax.f32 %v118_v11, 0.0 }
  0xfd   :  { %475 = vmatprep.mubr.f32.mxu1 %v126_v12 }
  0xfe   :  { %476 = vmatmul.mubr.f32.vlgmr.msra.gmra.mrb[0].mxu1 %v127_v13 }
 0x1d1   :  { %v477_v18 = vpop.f32.mrb[0].mxu1 }
 0x1d2   :  { %v223_v19 = vadd.f32 %v477_v18, %v350_v17  ;;  %v217_v20 = vpop.f32.mrb[1].mxu1 }
 0x1d3   :  { %v218_v21 = vadd.f32 %v350_v17, %v217_v20 }
 0x1d4   :  { %v227_v23 = vmax.f32 %v223_v19, 0.0 }
 0x1d5   :  { %v226_v22 = vmax.f32 %v218_v21, 0.0 }
 0x1d7   :  { %510 = vmatprep.mubr.f32.mxu0 %v226_v22 }
 0x1d8   :  { %511 = vmatmul.mubr.f32.vlgmr.msra.gmra.mrb[2].mxu0 %v227_v23 }
 0x2ab   :  { %v512_v25 = vpop.f32.mrb[2].mxu0 }
 0x2ac   :  { %v323_v26 = vadd.f32 %v512_v25, %v351_v24  ;;  %v317_v27 = vpop.f32.mrb[3].mxu0 }
 0x2ad   :  { %v318_v28 = vadd.f32 %v351_v24, %v317_v27 }
 0x2ae   :  { %v353_v29 = vmul.f32 -1.442695, %v323_v26 }
 0x2af   :  { %v352_v30 = vmul.f32 -1.442695, %v318_v28 }
 0x2b0   :  { %609 = vpow2.f32 %v353_v29 }
 0x2b1   :  { %611 = vpow2.f32 %v352_v30 }
 0x2ba   :  { %v610_v31 = vpop.eup %609 }
 0x2bb   :  { %v612_v32 = vpop.eup %611  ;;  %v336_v33 = vadd.f32 1.0, %v610_v31 }
 0x2bc   :  { %v335_v34 = vadd.f32 1.0, %v612_v32 }
 0x2bd   :  { %613 = vrcp.f32 %v336_v33 }
 0x2be   :  { %615 = vrcp.f32 %v335_v34 }
 0x2c7   :  { %v614_v37 = vpop.eup %613 }
 0x2c8   :  { %v616_v38 = vpop.eup %615  ;;  %v342_v39 = vsel %vm328_vm0, %v614_v37, %v323_v26 }
 0x2c9   :  { %344 = vst [vmem:[%s829_s7 + $0x8] sm:$0xff] %v342_v39  ;;  %v341_v40 = vsel %vm328_vm0, %v616_v38, %v318_v28 }
 0x2ca   :  { %343 = vst [vmem:[%s829_s7] sm:$0xff] %v341_v40 }

// kernel: _forward_impl.1
= control target key start
LH: loop header
LB: loop body
LE: loop exit
PB: predicated region body
PF: predicated region fallthrough
CT: control target
= control target key end

     0   :  { %s822_s1 = inlined_call_operand.vmem [shape: f32[128,128], index: 1, kind: input, shape index: {}]   ;;  %s823_s0 = inlined_call_operand.vmem [shape: f32[16,128], index: 0, kind: input, shape index: {}]   ;;  %s824_s3 = inlined_call_operand.vmem [shape: f32[128,128], index: 3, kind: input, shape index: {}]   ;;  %s825_s5 = inlined_call_operand.vmem [shape: f32[128,128], index: 5, kind: input, shape index: {}]   ;;  %s826_s2 = inlined_call_operand.vmem [shape: f32[1,128], index: 2, kind: input, shape index: {}]   ;;  %s827_s4 = inlined_call_operand.vmem [shape: f32[1,128], index: 4, kind: input, shape index: {}]   ;;  %s828_s6 = inlined_call_operand.vmem [shape: f32[1,128], index: 6, kind: input, shape index: {}]   ;;  %s829_s7 = inlined_call_operand.vmem [shape: f32[16,128], index: 7, kind: output, shape index: {}]  }
   0x1   :  { %v28_v0 = vld [vmem:[%s822_s1] sm:$0xff]  ;;  %v29_v1 = vld [vmem:[%s822_s1 + $0x8] sm:$0xff]  ;;  %v30_v2 = vld [vmem:[%s822_s1 + $0x10] sm:$0xff] }
   0x2   :  { %v513_v3 = vpack.c.bf16 %v29_v1, %v28_v0  ;;  %v31_v4 = vld [vmem:[%s822_s1 + $0x18] sm:$0xff]  ;;  %v32_v6 = vld [vmem:[%s822_s1 + $0x20] sm:$0xff]  ;;  %v33_v7 = vld [vmem:[%s822_s1 + $0x28] sm:$0xff] }
   0x3   :  { %v517_v5 = vpack.c.bf16 %v31_v4, %v30_v2  ;;  %v521_v8 = vpack.c.bf16 %v33_v7, %v32_v6  ;;  %v34_v9 = vld [vmem:[%s822_s1 + $0x30] sm:$0xff]  ;;  %v35_v10 = vld [vmem:[%s822_s1 + $0x38] sm:$0xff]  ;;  %v26_v11 = vld [vmem:[%s823_s0] sm:$0xff] }
   0x4   :  { %514 = vmatprep.subr.bf16.mxu0 %v513_v3  ;;  %440 = vmatprep.mubr.f32.mxu0 %v26_v11  ;;  %v128_v12 = vld [vmem:[%s824_s3] sm:$0xff]  ;;  %v129_v13 = vld [vmem:[%s824_s3 + $0x8] sm:$0xff]  ;;  %v130_v14 = vld [vmem:[%s824_s3 + $0x10] sm:$0xff]  ;;  %v525_v20 = vpack.c.bf16 %v35_v10, %v34_v9 }
   0x5   :  { %516 = vmatpush3.bf16.msra.mxu0 %v513_v3  ;;  %v545_v15 = vpack.c.bf16 %v129_v13, %v128_v12  ;;  %v131_v16 = vld [vmem:[%s824_s3 + $0x18] sm:$0xff]  ;;  %v132_v18 = vld [vmem:[%s824_s3 + $0x20] sm:$0xff]  ;;  %v133_v19 = vld [vmem:[%s824_s3 + $0x28] sm:$0xff] }
   0x6   :  { %518 = vmatprep.subr.bf16.mxu0 %v517_v5  ;;  %v549_v17 = vpack.c.bf16 %v131_v16, %v130_v14  ;;  %v36_v21 = vld [vmem:[%s822_s1 + $0x40] sm:$0xff]  ;;  %v37_v22 = vld [vmem:[%s822_s1 + $0x48] sm:$0xff]  ;;  %v553_v23 = vpack.c.bf16 %v133_v19, %v132_v18  ;;  %v134_v24 = vld [vmem:[%s824_s3 + $0x30] sm:$0xff] }
   0x7   :  { %546 = vmatprep.subr.bf16.mxu1 %v545_v15  ;;  %v135_v25 = vld [vmem:[%s824_s3 + $0x38] sm:$0xff]  ;;  %v529_v26 = vpack.c.bf16 %v37_v22, %v36_v21  ;;  %v38_v27 = vld [vmem:[%s822_s1 + $0x50] sm:$0xff]  ;;  %v136_v30 = vld [vmem:[%s824_s3 + $0x40] sm:$0xff] }
   0x8   :  { %548 = vmatpush3.bf16.msra.mxu1 %v545_v15  ;;  %v39_v28 = vld [vmem:[%s822_s1 + $0x58] sm:$0xff]  ;;  %v557_v29 = vpack.c.bf16 %v135_v25, %v134_v24  ;;  %v137_v31 = vld [vmem:[%s824_s3 + $0x48] sm:$0xff]  ;;  %v40_v33 = vld [vmem:[%s822_s1 + $0x60] sm:$0xff] }
   0x9   :  { %520 = vmatpush3.bf16.msra.mxu0 %v517_v5  ;;  %550 = vmatprep.subr.bf16.mxu1 %v549_v17  ;;  %v533_v32 = vpack.c.bf16 %v39_v28, %v38_v27  ;;  %v41_v34 = vld [vmem:[%s822_s1 + $0x68] sm:$0xff]  ;;  %v561_v35 = vpack.c.bf16 %v137_v31, %v136_v30  ;;  %v138_v36 = vld [vmem:[%s824_s3 + $0x50] sm:$0xff]  ;;  %v139_v37 = vld [vmem:[%s824_s3 + $0x58] sm:$0xff] }
   0xa   :  { %522 = vmatprep.subr.bf16.mxu0 %v521_v8  ;;  %v537_v38 = vpack.c.bf16 %v41_v34, %v40_v33  ;;  %v42_v39 = vld [vmem:[%s822_s1 + $0x70] sm:$0xff]  ;;  %v43_v40 = vld [vmem:[%s822_s1 + $0x78] sm:$0xff]  ;;  %v565_v41 = vpack.c.bf16 %v139_v37, %v138_v36  ;;  %v140_v42 = vld [vmem:[%s824_s3 + $0x60] sm:$0xff] }
   0xb   :  { %v141_v43 = vld [vmem:[%s824_s3 + $0x68] sm:$0xff]  ;;  %v541_v44 = vpack.c.bf16 %v43_v40, %v42_v39  ;;  %v142_v47 = vld [vmem:[%s824_s3 + $0x70] sm:$0xff]  ;;  %v143_v48 = vld [vmem:[%s824_s3 + $0x78] sm:$0xff] }
   0xc   :  { %552 = vmatpush3.bf16.msra.mxu1 %v549_v17  ;;  %v569_v45 = vpack.c.bf16 %v141_v43, %v140_v42  ;;  %v27_v46 = vld [vmem:[%s823_s0 + $0x8] sm:$0xff]  ;;  %v573_v49 = vpack.c.bf16 %v143_v48, %v142_v47  ;;  %v228_v50 = vld [vmem:[%s825_s5] sm:$0xff]  ;;  %v230_v52 = vld [vmem:[%s825_s5 + $0x10] sm:$0xff] }
   0xd   :  { %524 = vmatpush3.bf16.msra.mxu0 %v521_v8  ;;  %554 = vmatprep.subr.bf16.mxu1 %v553_v23  ;;  %v229_v51 = vld [vmem:[%s825_s5 + $0x8] sm:$0xff]  ;;  %v231_v54 = vld [vmem:[%s825_s5 + $0x18] sm:$0xff]  ;;  %v232_v56 = vld [vmem:[%s825_s5 + $0x20] sm:$0xff] }
   0xe   :  { %526 = vmatprep.subr.bf16.mxu0 %v525_v20  ;;  %v577_v53 = vpack.c.bf16 %v229_v51, %v228_v50  ;;  %v581_v55 = vpack.c.bf16 %v231_v54, %v230_v52  ;;  %v233_v57 = vld [vmem:[%s825_s5 + $0x28] sm:$0xff]  ;;  %v234_v59 = vld [vmem:[%s825_s5 + $0x30] sm:$0xff]  ;;  %v235_v60 = vld [vmem:[%s825_s5 + $0x38] sm:$0xff] }
   0xf   :  { %v585_v58 = vpack.c.bf16 %v233_v57, %v232_v56  ;;  %v589_v61 = vpack.c.bf16 %v235_v60, %v234_v59  ;;  %v236_v62 = vld [vmem:[%s825_s5 + $0x40] sm:$0xff]  ;;  %v237_v63 = vld [vmem:[%s825_s5 + $0x48] sm:$0xff]  ;;  %v238_v1 = vld [vmem:[%s825_s5 + $0x50] sm:$0xff] }
  0x10   :  { %556 = vmatpush3.bf16.msra.mxu1 %v553_v23  ;;  %v593_v0 = vpack.c.bf16 %v237_v63, %v236_v62  ;;  %v239_v2 = vld [vmem:[%s825_s5 + $0x58] sm:$0xff]  ;;  %v240_v4 = vld [vmem:[%s825_s5 + $0x60] sm:$0xff]  ;;  %v241_v5 = vld [vmem:[%s825_s5 + $0x68] sm:$0xff] }
  0x11   :  { %528 = vmatpush3.bf16.msra.mxu0 %v525_v20  ;;  %558 = vmatprep.subr.bf16.mxu1 %v557_v29  ;;  %v597_v3 = vpack.c.bf16 %v239_v2, %v238_v1  ;;  %v601_v6 = vpack.c.bf16 %v241_v5, %v240_v4  ;;  %v349_v7 = vld [vmem:[%s826_s2] ss:$0 sm:$0xff]  ;;  %v242_v14 = vld [vmem:[%s825_s5 + $0x70] sm:$0xff]  ;;  %v243_v15 = vld [vmem:[%s825_s5 + $0x78] sm:$0xff] }
  0x12   :  { %530 = vmatprep.subr.bf16.mxu0 %v529_v26  ;;  %v605_v16 = vpack.c.bf16 %v243_v15, %v242_v14  ;;  %v350_v17 = vld [vmem:[%s827_s4] ss:$0 sm:$0xff] }
  0x13   :  { %v351_v24 = vld [vmem:[%s828_s6] ss:$0 sm:$0xff] }
  0x14   :  { %560 = vmatpush3.bf16.msra.mxu1 %v557_v29 }
  0x15   :  { %532 = vmatpush3.bf16.msra.mxu0 %v529_v26  ;;  %562 = vmatprep.subr.bf16.mxu1 %v561_v35 }
  0x16   :  { %534 = vmatprep.subr.bf16.mxu0 %v533_v32 }
  0x18   :  { %564 = vmatpush3.bf16.msra.mxu1 %v561_v35  ;;  %v326_v35 = vlaneseq }
  0x19   :  { %536 = vmatpush3.bf16.msra.mxu0 %v533_v32  ;;  %566 = vmatprep.subr.bf16.mxu1 %v565_v41 }
  0x1a   :  { %538 = vmatprep.subr.bf16.mxu0 %v537_v38  ;;  %v327_v36 = vand.u32 127, %v326_v35 }
  0x1c   :  { %568 = vmatpush3.bf16.msra.mxu1 %v565_v41  ;;  %vm328_vm0 = vcmp.eq.s32.totalorder %v327_v36, 0 }
  0x1d   :  { %540 = vmatpush3.bf16.msra.mxu0 %v537_v38  ;;  %570 = vmatprep.subr.bf16.mxu1 %v569_v45 }
  0x1e   :  { %542 = vmatprep.subr.bf16.mxu0 %v541_v44 }
  0x20   :  { %572 = vmatpush3.bf16.msra.mxu1 %v569_v45 }
  0x21   :  { %544 = vmatpush3.bf16.msra.mxu0 %v541_v44  ;;  %574 = vmatprep.subr.bf16.mxu1 %v573_v49 }
  0x22   :  { %578 = vmatprep.subr.bf16.mxu0 %v577_v53 }
  0x24   :  { %441 = vmatmul.mubr.f32.vlgmr.msra.gmra.mrb[0].mxu0 %v27_v46  ;;  %576 = vmatpush3.bf16.msra.mxu1 %v573_v49 }
  0x25   :  { %580 = vmatpush3.bf16.msra.mxu0 %v577_v53 }
  0x26   :  { %582 = vmatprep.subr.bf16.mxu0 %v581_v55 }
  0x29   :  { %584 = vmatpush3.bf16.msra.mxu0 %v581_v55 }
  0x2a   :  { %586 = vmatprep.subr.bf16.mxu0 %v585_v58 }
  0x2d   :  { %588 = vmatpush3.bf16.msra.mxu0 %v585_v58 }
  0x2e   :  { %590 = vmatprep.subr.bf16.mxu0 %v589_v61 }
  0x31   :  { %592 = vmatpush3.bf16.msra.mxu0 %v589_v61 }
  0x32   :  { %594 = vmatprep.subr.bf16.mxu0 %v593_v0 }
  0x35   :  { %596 = vmatpush3.bf16.msra.mxu0 %v593_v0 }
  0x36   :  { %598 = vmatprep.subr.bf16.mxu0 %v597_v3 }
  0x39   :  { %600 = vmatpush3.bf16.msra.mxu0 %v597_v3 }
  0x3a   :  { %602 = vmatprep.subr.bf16.mxu0 %v601_v6 }
  0x3d   :  { %604 = vmatpush3.bf16.msra.mxu0 %v601_v6 }
  0x3e   :  { %606 = vmatprep.subr.bf16.mxu0 %v605_v16 }
  0x41   :  { %608 = vmatpush3.bf16.msra.mxu0 %v605_v16 }
  0xf7   :  { %v442_v8 = vpop.f32.mrb[0].mxu0 }
  0xf8   :  { %v123_v9 = vadd.f32 %v442_v8, %v349_v7  ;;  %v117_v10 = vpop.f32.mrb[1].mxu0 }
  0xf9   :  { %v118_v11 = vadd.f32 %v349_v7, %v117_v10 }
  0xfa   :  { %v127_v13 = vmax.f32 %v123_v9, 0.0 }
  0xfb   :  { %v126_v12 = vmax.f32 %v118_v11, 0.0 }
  0xfd   :  { %475 = vmatprep.mubr.f32.mxu1 %v126_v12 }
  0xfe   :  { %476 = vmatmul.mubr.f32.vlgmr.msra.gmra.mrb[0].mxu1 %v127_v13 }
 0x1d1   :  { %v477_v18 = vpop.f32.mrb[0].mxu1 }
 0x1d2   :  { %v223_v19 = vadd.f32 %v477_v18, %v350_v17  ;;  %v217_v20 = vpop.f32.mrb[1].mxu1 }
 0x1d3   :  { %v218_v21 = vadd.f32 %v350_v17, %v217_v20 }
 0x1d4   :  { %v227_v23 = vmax.f32 %v223_v19, 0.0 }
 0x1d5   :  { %v226_v22 = vmax.f32 %v218_v21, 0.0 }
 0x1d7   :  { %510 = vmatprep.mubr.f32.mxu0 %v226_v22 }
 0x1d8   :  { %511 = vmatmul.mubr.f32.vlgmr.msra.gmra.mrb[2].mxu0 %v227_v23 }
 0x2ab   :  { %v512_v25 = vpop.f32.mrb[2].mxu0 }
 0x2ac   :  { %v323_v26 = vadd.f32 %v512_v25, %v351_v24  ;;  %v317_v27 = vpop.f32.mrb[3].mxu0 }
 0x2ad   :  { %v318_v28 = vadd.f32 %v351_v24, %v317_v27 }
 0x2ae   :  { %v353_v29 = vmul.f32 -1.442695, %v323_v26 }
 0x2af   :  { %v352_v30 = vmul.f32 -1.442695, %v318_v28 }
 0x2b0   :  { %609 = vpow2.f32 %v353_v29 }
 0x2b1   :  { %611 = vpow2.f32 %v352_v30 }
 0x2ba   :  { %v610_v31 = vpop.eup %609 }
 0x2bb   :  { %v612_v32 = vpop.eup %611  ;;  %v336_v33 = vadd.f32 1.0, %v610_v31 }
 0x2bc   :  { %v335_v34 = vadd.f32 1.0, %v612_v32 }
 0x2bd   :  { %613 = vrcp.f32 %v336_v33 }
 0x2be   :  { %615 = vrcp.f32 %v335_v34 }
 0x2c7   :  { %v614_v37 = vpop.eup %613 }
 0x2c8   :  { %v616_v38 = vpop.eup %615  ;;  %v342_v39 = vsel %vm328_vm0, %v614_v37, %v323_v26 }
 0x2c9   :  { %344 = vst [vmem:[%s829_s7 + $0x8] sm:$0xff] %v342_v39  ;;  %v341_v40 = vsel %vm328_vm0, %v616_v38, %v318_v28 }
 0x2ca   :  { %343 = vst [vmem:[%s829_s7] sm:$0xff] %v341_v40 }

</bundles_post_ra>
